<compile_context>
chip_gen: v7x
topology: tpu7x:2x2x1
jax: 0.10.0
libtpu: 0.0.40
codegen_flags: <defaults>
</compile_context>

<pallas_src>
import jax
import jax.numpy as jnp
from jax.experimental import pallas as pl
from jax.experimental.pallas import tpu as pltpu

_MAX_TL = 128 * 1024                  # lane-axis tile (elements); multiple of 128
_TARGET_BLOCK_ELEMS = 4 * _MAX_TL     # ~2 MiB f32 per block


def _haar4_kernel(x_ref, o_ref):
    # x_ref, o_ref: (TG, 4, TL).  The 4 input rows are the four 2x2 "partners"
    # (patch pixels for dec, sub-band coefficients for rec); the 4 output rows
    # are the four results.  The Haar sign matrix is symmetric, so the same
    # butterfly serves both directions:  out[i] = 0.5 * sum_k S[i,k] * in[k].
    a = x_ref[:, 0, :].astype(jnp.float32)
    b = x_ref[:, 1, :].astype(jnp.float32)
    c = x_ref[:, 2, :].astype(jnp.float32)
    d = x_ref[:, 3, :].astype(jnp.float32)
    s0 = a + b
    s1 = a - b
    s2 = c + d
    s3 = c - d
    dt = o_ref.dtype
    o_ref[:, 0, :] = ((s0 + s2) * 0.5).astype(dt)
    o_ref[:, 1, :] = ((s1 + s3) * 0.5).astype(dt)
    o_ref[:, 2, :] = ((s0 - s2) * 0.5).astype(dt)
    o_ref[:, 3, :] = ((s1 - s3) * 0.5).astype(dt)


def _choose_tiles(G, L):
    # Lane tile: as big as possible.  If we tile L, keep TL a multiple of 128 so
    # every vld/vst is full-lane; if we take the whole axis, "equal full dim" is
    # always legal.
    if L <= _MAX_TL:
        tl = L
    else:
        tl = _MAX_TL
    # Grow the leading tile so each block is ~2 MiB even when L is small.
    tg = max(1, min(G, _TARGET_BLOCK_ELEMS // max(4 * tl, 1)))
    return tg, tl


def _haar4(xs):
    """xs: (G, 4, L) -> (G, 4, L) orthonormal 2x2 Haar butterfly along axis 1."""
    G, four, L = xs.shape
    assert four == 4
    tg, tl = _choose_tiles(G, L)
    grid = (pl.cdiv(G, tg), pl.cdiv(L, tl))
    return pl.pallas_call(
        _haar4_kernel,
        out_shape=jax.ShapeDtypeStruct((G, 4, L), xs.dtype),
        grid_spec=pltpu.PrefetchScalarGridSpec(
            num_scalar_prefetch=0,
            grid=grid,
            in_specs=[pl.BlockSpec((tg, 4, tl), lambda g, l: (g, 0, l))],
            out_specs=pl.BlockSpec((tg, 4, tl), lambda g, l: (g, 0, l)),
        ),
        compiler_params=pltpu.CompilerParams(
            dimension_semantics=("parallel", "parallel")),
    )(xs)


def _haar_filters_2d(ks):
    """Deterministic orthonormal 2-D Haar filter bank, shape (ks*ks, ks, ks)."""
    assert ks == 2, "deterministic Haar init implemented for scale=1 (ks=2)"
    h = jnp.array([[1.0, 1.0], [1.0, -1.0]], dtype=jnp.float32) / jnp.sqrt(2.0)
    return jnp.einsum("ad,be->abde", h, h).reshape(ks * ks, ks, ks)


class WaveletTransform:
    """JAX/Pallas port of the PyTorch WaveletTransform module (forward only)."""

    def __init__(self, scale=1, dec=True, transpose=True, cdim=3):
        self.scale = scale
        self.dec = dec
        self.transpose = transpose
        if scale == 0:
            return
        self.cdim = cdim
        ks = int(2 ** scale)
        self.ks = ks
        filt = _haar_filters_2d(ks)                       # (4, 2, 2)
        # PyTorch conv weight layout (nc, 1, ks, ks): bank repeated per channel.
        self.weight = jnp.tile(filt[:, None], (cdim, 1, 1, 1))

    def __call__(self, x):
        if self.scale == 0:
            return x
        C = self.cdim
        if self.dec:
            N, _, H, W = x.shape
            oH, oW = H // 2, W // 2
            # Four strided views = the four pixels of each non-overlapping 2x2 patch.
            x00 = x[:, :, 0:2 * oH:2, 0:2 * oW:2]
            x01 = x[:, :, 0:2 * oH:2, 1:2 * oW:2]
            x10 = x[:, :, 1:2 * oH:2, 0:2 * oW:2]
            x11 = x[:, :, 1:2 * oH:2, 1:2 * oW:2]
            if self.transpose:
                # output channel order f*C + c  (matches .view(...).transpose(1,2))
                xs = jnp.stack([x00, x01, x10, x11], axis=1)      # (N, 4, C, oH, oW)
                out = _haar4(xs.reshape(N, 4, C * oH * oW))
                return out.reshape(N, 4 * C, oH, oW)              # free view
            else:
                # grouped-conv native channel order c*4 + f
                xs = jnp.stack([x00, x01, x10, x11], axis=2)      # (N, C, 4, oH, oW)
                out = _haar4(xs.reshape(N * C, 4, oH * oW))
                return out.reshape(N, C * 4, oH, oW)              # free view
        else:
            N, _, oH, oW = x.shape                                # channels = 4*C
            if self.transpose:
                ys = x.reshape(N, 4, C * oH * oW)                 # free view (f*C + c)
                out = _haar4(ys).reshape(N, 2, 2, C, oH, oW)      # (n, dy, dx, c, i, j)
                out = out.transpose(0, 3, 4, 1, 5, 2)             # (n, c, i, dy, j, dx)
                return out.reshape(N, C, 2 * oH, 2 * oW)
            else:
                ys = x.reshape(N * C, 4, oH * oW)                 # free view (c*4 + f)
                out = _haar4(ys).reshape(N, C, 2, 2, oH, oW)      # (n, c, dy, dx, i, j)
                out = out.transpose(0, 1, 4, 2, 5, 3)             # (n, c, i, dy, j, dx)
                return out.reshape(N, C, 2 * oH, 2 * oW)


if __name__ == "__main__":
    key = jax.random.PRNGKey(0)
    N, C, H, W = 2, 3, 16, 16
    x = jax.random.normal(key, (N, C, H, W), dtype=jnp.float32)

    # --- decomposition, transpose=True (module defaults) ---
    wt_dec = WaveletTransform(scale=1, dec=True, transpose=True, cdim=C)
    y = jax.block_until_ready(wt_dec(x))
    assert y.shape == (N, 4 * C, H // 2, W // 2)

    # Reference: grouped strided conv via lax + the same channel reorder.
    ref = jax.lax.conv_general_dilated(
        x, wt_dec.weight, window_strides=(2, 2), padding="VALID",
        dimension_numbers=("NCHW", "OIHW", "NCHW"), feature_group_count=C)
    osz = ref.shape
    ref_t = (ref.reshape(osz[0], C, -1, osz[2], osz[3])
                .transpose(0, 2, 1, 3, 4).reshape(osz))
    assert jnp.allclose(y, ref_t, atol=1e-5, rtol=1e-5), "dec(transpose) mismatch"

    # --- decomposition, transpose=False (grouped-conv native order) ---
    wt_dec_nt = WaveletTransform(scale=1, dec=True, transpose=False, cdim=C)
    y_nt = jax.block_until_ready(wt_dec_nt(x))
    assert jnp.allclose(y_nt, ref, atol=1e-5, rtol=1e-5), "dec(no-transpose) mismatch"

    # --- reconstruction round-trips (orthonormal Haar bank) ---
    wt_rec = WaveletTransform(scale=1, dec=False, transpose=True, cdim=C)
    xr = jax.block_until_ready(wt_rec(y))
    assert jnp.allclose(xr, x, atol=1e-4, rtol=1e-4), "rec(transpose) round-trip mismatch"

    wt_rec_nt = WaveletTransform(scale=1, dec=False, transpose=False, cdim=C)
    xr_nt = jax.block_until_ready(wt_rec_nt(y_nt))
    assert jnp.allclose(xr_nt, x, atol=1e-4, rtol=1e-4), "rec(no-transpose) round-trip mismatch"

    print("KERNEL_OK")
</pallas_src>

<mosaic_0001>
module attributes {stable_mosaic.version = 11 : i64} {
  func.func @_haar4_kernel(%arg0: i32, %arg1: i32, %arg2: memref<2x4x192xf32, #tpu.memory_space<vmem>>, %arg3: memref<2x4x192xf32, #tpu.memory_space<vmem>>) attributes {dimension_semantics = [#tpu.dimension_semantics<parallel>, #tpu.dimension_semantics<parallel>], iteration_bounds = array<i64: 1, 1>, scalar_prefetch = 0 : i64, scratch_operands = 0 : i64, tpu.core_type = #tpu.core_type<tc>, window_params = [{transform_indices = @transform_0, window_bounds = array<i64: 2, 4, 192>}, {transform_indices = @transform_1, window_bounds = array<i64: 2, 4, 192>}]} {
    %c0 = arith.constant 0 : index
    %c0_0 = arith.constant 0 : index
    %c0_1 = arith.constant 0 : index
    %0 = vector.load %arg2[%c0, %c0_0, %c0_1] : memref<2x4x192xf32, #tpu.memory_space<vmem>>, vector<2x1x192xf32>
    %1 = vector.shape_cast %0 : vector<2x1x192xf32> to vector<2x192xf32>
    %c0_2 = arith.constant 0 : index
    %c1 = arith.constant 1 : index
    %c0_3 = arith.constant 0 : index
    %2 = vector.load %arg2[%c0_2, %c1, %c0_3] : memref<2x4x192xf32, #tpu.memory_space<vmem>>, vector<2x1x192xf32>
    %3 = vector.shape_cast %2 : vector<2x1x192xf32> to vector<2x192xf32>
    %c0_4 = arith.constant 0 : index
    %c2 = arith.constant 2 : index
    %c0_5 = arith.constant 0 : index
    %4 = vector.load %arg2[%c0_4, %c2, %c0_5] : memref<2x4x192xf32, #tpu.memory_space<vmem>>, vector<2x1x192xf32>
    %5 = vector.shape_cast %4 : vector<2x1x192xf32> to vector<2x192xf32>
    %c0_6 = arith.constant 0 : index
    %c3 = arith.constant 3 : index
    %c0_7 = arith.constant 0 : index
    %6 = vector.load %arg2[%c0_6, %c3, %c0_7] : memref<2x4x192xf32, #tpu.memory_space<vmem>>, vector<2x1x192xf32>
    %7 = vector.shape_cast %6 : vector<2x1x192xf32> to vector<2x192xf32>
    %8 = arith.addf %1, %3 : vector<2x192xf32>
    %9 = arith.subf %1, %3 : vector<2x192xf32>
    %10 = arith.addf %5, %7 : vector<2x192xf32>
    %11 = arith.subf %5, %7 : vector<2x192xf32>
    %12 = arith.addf %8, %10 : vector<2x192xf32>
    %cst = arith.constant 5.000000e-01 : f32
    %13 = vector.broadcast %cst : f32 to vector<2x192xf32>
    %14 = arith.mulf %12, %13 : vector<2x192xf32>
    %c0_8 = arith.constant 0 : index
    %c0_9 = arith.constant 0 : index
    %c0_10 = arith.constant 0 : index
    %15 = vector.load %arg3[%c0_8, %c0_9, %c0_10] : memref<2x4x192xf32, #tpu.memory_space<vmem>>, vector<2x1x192xf32>
    %16 = vector.shape_cast %15 : vector<2x1x192xf32> to vector<2x192xf32>
    %17 = vector.shape_cast %14 : vector<2x192xf32> to vector<2x1x192xf32>
    tpu.vector_store %arg3[%c0_8, %c0_9, %c0_10], %17 {strides = array<i32>} : memref<2x4x192xf32, #tpu.memory_space<vmem>>, vector<2x1x192xf32>,
    %18 = arith.addf %9, %11 : vector<2x192xf32>
    %cst_11 = arith.constant 5.000000e-01 : f32
    %19 = vector.broadcast %cst_11 : f32 to vector<2x192xf32>
    %20 = arith.mulf %18, %19 : vector<2x192xf32>
    %c0_12 = arith.constant 0 : index
    %c1_13 = arith.constant 1 : index
    %c0_14 = arith.constant 0 : index
    %21 = vector.load %arg3[%c0_12, %c1_13, %c0_14] : memref<2x4x192xf32, #tpu.memory_space<vmem>>, vector<2x1x192xf32>
    %22 = vector.shape_cast %21 : vector<2x1x192xf32> to vector<2x192xf32>
    %23 = vector.shape_cast %20 : vector<2x192xf32> to vector<2x1x192xf32>
    tpu.vector_store %arg3[%c0_12, %c1_13, %c0_14], %23 {strides = array<i32>} : memref<2x4x192xf32, #tpu.memory_space<vmem>>, vector<2x1x192xf32>,
    %24 = arith.subf %8, %10 : vector<2x192xf32>
    %cst_15 = arith.constant 5.000000e-01 : f32
    %25 = vector.broadcast %cst_15 : f32 to vector<2x192xf32>
    %26 = arith.mulf %24, %25 : vector<2x192xf32>
    %c0_16 = arith.constant 0 : index
    %c2_17 = arith.constant 2 : index
    %c0_18 = arith.constant 0 : index
    %27 = vector.load %arg3[%c0_16, %c2_17, %c0_18] : memref<2x4x192xf32, #tpu.memory_space<vmem>>, vector<2x1x192xf32>
    %28 = vector.shape_cast %27 : vector<2x1x192xf32> to vector<2x192xf32>
    %29 = vector.shape_cast %26 : vector<2x192xf32> to vector<2x1x192xf32>
    tpu.vector_store %arg3[%c0_16, %c2_17, %c0_18], %29 {strides = array<i32>} : memref<2x4x192xf32, #tpu.memory_space<vmem>>, vector<2x1x192xf32>,
    %30 = arith.subf %9, %11 : vector<2x192xf32>
    %cst_19 = arith.constant 5.000000e-01 : f32
    %31 = vector.broadcast %cst_19 : f32 to vector<2x192xf32>
    %32 = arith.mulf %30, %31 : vector<2x192xf32>
    %c0_20 = arith.constant 0 : index
    %c3_21 = arith.constant 3 : index
    %c0_22 = arith.constant 0 : index
    %33 = vector.load %arg3[%c0_20, %c3_21, %c0_22] : memref<2x4x192xf32, #tpu.memory_space<vmem>>, vector<2x1x192xf32>
    %34 = vector.shape_cast %33 : vector<2x1x192xf32> to vector<2x192xf32>
    %35 = vector.shape_cast %32 : vector<2x192xf32> to vector<2x1x192xf32>
    tpu.vector_store %arg3[%c0_20, %c3_21, %c0_22], %35 {strides = array<i32>} : memref<2x4x192xf32, #tpu.memory_space<vmem>>, vector<2x1x192xf32>,
    return
  }
  func.func @transform_0(%arg0: i32, %arg1: i32) -> (i32, i32, i32) {
    %c0_i32 = arith.constant 0 : i32
    %c0_i32_0 = arith.constant 0 : i32
    return %arg0, %c0_i32, %arg1 : i32, i32, i32
  }
  func.func @transform_1(%arg0: i32, %arg1: i32) -> (i32, i32, i32) {
    %c0_i32 = arith.constant 0 : i32
    %c0_i32_0 = arith.constant 0 : i32
    return %arg0, %c0_i32, %arg1 : i32, i32, i32
  }
}

</mosaic_0001>

<bundles_post_ra>
// kernel: tpu_custom_call.1
= control target key start
LH: loop header
LB: loop body
LE: loop exit
PB: predicated region body
PF: predicated region fallthrough
CT: control target
= control target key end

     0   :  { %6 = vsyncpa [#allocation3], 0  ;;  %s214_s0 = inlined_call_operand.hbm [shape: f32[2,4,192], index: 0, kind: input, shape index: {}]   ;;  %s215_s1 = inlined_call_operand.hbm [shape: f32[2,4,192], index: 1, kind: output, shape index: {}]  }
   0x1   :  { %7 = vsyncpa [#allocation4], 0  ;;  %s150_s6 = smov [#allocation2]   ;;  %s102_s10 = scalar_lea.hbm %s214_s0, 256 }
   0x2   :  { %s13_s7 = sshll.u32 %s150_s6, 4  ;;  %p103_p0 = scmp.ne.s32.totalorder %s214_s0, %s102_s10  ;;  %s14_s7 = int_to_ptr.vmem [resolvable:$true] %s13_s7 }
   0x3   :  { %p106_p1 = scmp.lt.u32.totalorder %s102_s10, %s214_s0 }
   0x5   :  { %p108_p2 = pnand %p106_p1, %p103_p0 }
   0x7   :  { %111 = shalt.err (!%p108_p2)
}
   0x8   :  { %s112_s15 = scalar_lea.vmem %s14_s7, 256  ;;  %p117_p4 = scmp.lt.s32.totalorder %s14_s7, %s14_s7 }
   0x9   :  { %p113_p3 = scmp.ne.s32.totalorder %s14_s7, %s112_s15  ;;  %p118_p5 = scmp.lt.s32.totalorder %s112_s15, %s112_s15 }
   0xb   :  { %p119_p6 = por %p118_p5, %p117_p4 }
   0xd   :  { %p120_p7 = pnand %p119_p6, %p113_p3 }
   0xf   :  { %123 = shalt.err (!%p120_p7)
}
  0x10   :  { %s151_s16 = smov 128   ;;  %s152_s17 = smov 8  }
  0x11   :  { %19 = dma.hbm_to_vmem [thread:$0]  %s214_s0, 256, %s14_s7, [#allocation3], %s151_s16, %s151_s16, %s152_s17  }
  0x12   :  { %146 = dma.done.wait [#allocation3], 256  }
  0x13   :  { %147 = vsyncadd [#allocation3], 4294967040  ;;  %v23_v0 = vld [vmem:[#allocation2] ss:$4 sm:$0x3]  ;;  %v50_v5 = vlaneseq  ;;  %s153_s0 = smov [#allocation5]  }
  0x14   :  { %v27_v1 = vld [vmem:[#allocation2 + $0x1] ss:$4 sm:$0x3]  ;;  %v31_v2 = vld [vmem:[#allocation2 + $0x2] ss:$4 sm:$0x3] }
  0x15   :  { %v35_v3 = vld [vmem:[#allocation2 + $0x3] ss:$4 sm:$0x3]  ;;  %v38_v4 = vadd.f32 %v27_v1, %v23_v0  ;;  %v40_v6 = vsub.f32 %v23_v0, %v27_v1  ;;  %v25_v8 = vld [vmem:[#allocation2 + $0x8] ss:$4 sm:$0x3] }
  0x16   :  { %v42_v7 = vadd.f32 %v35_v3, %v31_v2  ;;  %v29_v9 = vld [vmem:[#allocation2 + $0x9] ss:$4 sm:$0x3]  ;;  %v44_v10 = vsub.f32 %v31_v2, %v35_v3  ;;  %v33_v11 = vld [vmem:[#allocation2 + $0xa] ss:$4 sm:$0x3] }
  0x17   :  { %v37_v12 = vld [vmem:[#allocation2 + $0xb] ss:$4 sm:$0x3]  ;;  %v39_v13 = vadd.f32 %v29_v9, %v25_v8  ;;  %v41_v14 = vsub.f32 %v25_v8, %v29_v9  ;;  %vm179_vm0 = vcmp.lt.s32.totalorder %v50_v5, 192  ;;  %s86_s20 = sshll.u32 %s153_s0, 4  ;;  %s87_s20 = int_to_ptr.vmem [resolvable:$true] %s86_s20 }
  0x18   :  { %v46_v15 = vadd.f32 %v42_v7, %v38_v4  ;;  %v43_v16 = vadd.f32 %v37_v12, %v33_v11  ;;  %v57_v17 = vadd.f32 %v44_v10, %v40_v6  ;;  %v45_v18 = vsub.f32 %v33_v11, %v37_v12  ;;  %s124_s21 = scalar_lea.vmem %s87_s20, 256  ;;  %p129_p9 = scmp.lt.s32.totalorder %s87_s20, %s87_s20 }
  0x19   :  { %v65_v20 = vsub.f32 %v38_v4, %v42_v7  ;;  %v73_v21 = vsub.f32 %v40_v6, %v44_v10  ;;  %p125_p8 = scmp.ne.s32.totalorder %s87_s20, %s124_s21  ;;  %p130_p10 = scmp.lt.s32.totalorder %s124_s21, %s124_s21 }
  0x1a   :  { %v48_v22 = vmul.f32 0.5, %v46_v15  ;;  %v47_v23 = vadd.f32 %v43_v16, %v39_v13  ;;  %v59_v24 = vmul.f32 0.5, %v57_v17  ;;  %v58_v25 = vadd.f32 %v45_v18, %v41_v14 }
  0x1b   :  { %v67_v26 = vmul.f32 0.5, %v65_v20  ;;  %v66_v27 = vsub.f32 %v39_v13, %v43_v16  ;;  %v75_v28 = vmul.f32 0.5, %v73_v21  ;;  %v74_v29 = vsub.f32 %v41_v14, %v45_v18  ;;  %p131_p11 = por %p130_p10, %p129_p9 }
  0x1c   :  { %54 = vst.msk [vmem:[#allocation5] ss:$4 sm:$0x3] %vm179_vm0, %v48_v22  ;;  %v49_v30 = vmul.f32 0.5, %v47_v23  ;;  %v60_v31 = vmul.f32 0.5, %v58_v25 }
  0x1d   :  { %62 = vst.msk [vmem:[#allocation5 + $0x1] ss:$4 sm:$0x3] %vm179_vm0, %v59_v24  ;;  %70 = vst.msk [vmem:[#allocation5 + $0x2] ss:$4 sm:$0x3] %vm179_vm0, %v67_v26  ;;  %p132_p12 = pnand %p131_p11, %p125_p8 }
  0x1e   :  { %v68_v32 = vmul.f32 0.5, %v66_v27  ;;  %78 = vst.msk [vmem:[#allocation5 + $0x3] ss:$4 sm:$0x3] %vm179_vm0, %v75_v28  ;;  %v76_v33 = vmul.f32 0.5, %v74_v29 }
  0x1f   :  { %56 = vst.msk [vmem:[#allocation5 + $0x8] ss:$4 sm:$0x3] %vm179_vm0, %v49_v30  ;;  %64 = vst.msk [vmem:[#allocation5 + $0x9] ss:$4 sm:$0x3] %vm179_vm0, %v60_v31 }
  0x20   :  { %72 = vst.msk [vmem:[#allocation5 + $0xa] ss:$4 sm:$0x3] %vm179_vm0, %v68_v32  ;;  %80 = vst.msk [vmem:[#allocation5 + $0xb] ss:$4 sm:$0x3] %vm179_vm0, %v76_v33 }
  0x21   :  { %135 = shalt.err (!%p132_p12)
}
  0x22   :  { %s136_s24 = scalar_lea.hbm %s215_s1, 256 }
  0x23   :  { %p137_p13 = scmp.ne.s32.totalorder %s215_s1, %s136_s24  ;;  %p140_p0 = scmp.lt.u32.totalorder %s136_s24, %s215_s1 }
  0x25   :  { %p142_p1 = pnand %p140_p0, %p137_p13 }
  0x27   :  { %145 = shalt.err (!%p142_p1)
}
  0x28   :  { %92 = dma.vmem_to_hbm [thread:$0]  %s87_s20, 256, %s215_s1, [#allocation4], %s151_s16, %s151_s16, %s152_s17  }
  0x29   :  { %148 = dma.done.wait [#allocation4], 256  }
  0x2a   :  { %149 = vsyncadd [#allocation4], 4294967040 }
  0x2b   :  { %96 = vsyncpa [#allocation3], 1 }
  0x2c   :  { %97 = vsyncpa [#allocation4], 1 }

</bundles_post_ra>
